<compile_context>
chip_gen: v7x
topology: tpu7x:2x2x1
jax: 0.10.0
libtpu: 0.0.40
codegen_flags: <defaults>
</compile_context>

<pallas_src>
import functools
import math

import jax
import jax.numpy as jnp
from jax.experimental import pallas as pl
from jax.experimental.pallas import tpu as pltpu

EPS = 1e-5
TARGET_BLOCK_BYTES = 8 * 1024 * 1024    # ~8 MiB input tiles (x2 buffers)
CONV_BLOCK_BYTES = 4 * 1024 * 1024      # conv pass activation tile target
MAX_BLOCK_ROWS = 8192                   # bounds (rows,1) scale/bias VMEM padding
VMEM_LIMIT_BYTES = 48 * 1024 * 1024     # < 64 MiB physical VMEM on v7x


# --------------------------------------------------------------------------
# Pass 1: per-(n, c) sum / sum-of-squares on the flat (N*C, H*W) NCHW view.
# Fully "parallel" grid (each block owns its output rows) -> both v7x TCs.
# --------------------------------------------------------------------------
def _stats_kernel(x_ref, sum_ref, sq_ref):
    x = x_ref[...].astype(jnp.float32)
    sum_ref[...] = jnp.sum(x, axis=1, keepdims=True)
    sq_ref[...] = jnp.sum(x * x, axis=1, keepdims=True)


# --------------------------------------------------------------------------
# Pass 2a: folded BN + ReLU + 2x2 avg-pool on the (N*C*Ho, 2*W) row-pair view.
# Pooling = one (tr, 2W) @ (2W, Wo) matmul against a constant 0/0.25 matrix.
# --------------------------------------------------------------------------
def _bn_relu_pool_kernel(x_ref, rs_ref, rb_ref, p_ref, o_ref):
    x = x_ref[...].astype(jnp.float32)
    y = jnp.maximum(x * rs_ref[...] + rb_ref[...], 0.0)     # folded BN + ReLU
    pooled = jnp.dot(y, p_ref[...], preferred_element_type=jnp.float32)
    o_ref[...] = pooled.astype(o_ref.dtype)


# --------------------------------------------------------------------------
# Pass 2b: 1x1 conv as per-image (C_out, C) @ (C, Ho*Wo) -> NCHW output.
# --------------------------------------------------------------------------
def _conv1x1_kernel(x_ref, w_ref, o_ref, *, n_img):
    w = w_ref[...]
    for i in range(n_img):                                   # static unroll
        out = jnp.dot(w, x_ref[i], preferred_element_type=jnp.float32)
        o_ref[i] = out.astype(o_ref.dtype)


def _legal_rows(r, total):
    """Row-block size must be a multiple of 8 or the full extent."""
    return r if (r % 8 == 0) else total


# --------------------------------------------------------------------------
# Wrapper
# --------------------------------------------------------------------------
@jax.jit
def dn_transition_block(x_nchw, gamma, beta, conv_w):
    """x_nchw: (N, C_in, H, W); conv_w: (C_out, C_in, 1, 1). Returns NCHW."""
    N, C, H, W = x_nchw.shape
    C_out = conv_w.shape[0]
    assert H % 2 == 0 and W % 2 == 0
    Ho, Wo = H // 2, W // 2
    HW = H * W
    P = Ho * Wo
    itemsize = x_nchw.dtype.itemsize
    out_dtype = x_nchw.dtype

    # ---------------- pass 1: BN batch statistics (NCHW-native) ----------------
    rows1 = N * C
    x_rows = x_nchw.reshape(rows1, HW)                        # free view
    cap1 = max(8, min(MAX_BLOCK_ROWS,
                      (TARGET_BLOCK_BYTES // (HW * itemsize)) // 8 * 8))
    tr1 = _legal_rows(min(cap1, rows1), rows1)
    grid1 = pl.cdiv(rows1, tr1)

    row_sum, row_sq = pl.pallas_call(
        _stats_kernel,
        out_shape=(jax.ShapeDtypeStruct((rows1, 1), jnp.float32),
                   jax.ShapeDtypeStruct((rows1, 1), jnp.float32)),
        grid=(grid1,),
        in_specs=[pl.BlockSpec((tr1, HW), lambda i: (i, 0))],
        out_specs=(pl.BlockSpec((tr1, 1), lambda i: (i, 0)),
                   pl.BlockSpec((tr1, 1), lambda i: (i, 0))),
        compiler_params=pltpu.CompilerParams(
            dimension_semantics=("parallel",),
            vmem_limit_bytes=VMEM_LIMIT_BYTES),
        cost_estimate=pl.CostEstimate(
            flops=3 * rows1 * HW, transcendentals=0,
            bytes_accessed=rows1 * HW * itemsize + 2 * rows1 * 4),
    )(x_rows)

    # Tiny (N, C)-sized finalize in XLA: training-mode BN, biased variance.
    # (E[x^2]-E[x]^2 in f32; clamp >=0 to guard against cancellation.)
    inv_cnt = 1.0 / float(N * HW)
    mean = row_sum.reshape(N, C).sum(axis=0) * inv_cnt
    var = jnp.maximum(row_sq.reshape(N, C).sum(axis=0) * inv_cnt - mean * mean, 0.0)
    scale = gamma.astype(jnp.float32) * jax.lax.rsqrt(var + EPS)
    bias = beta.astype(jnp.float32) - mean * scale

    # ---------------- pass 2a: folded BN + ReLU + 2x2 avg-pool ----------------
    use_bf16 = C >= 128                                       # keep tiny test exact
    pooled_dtype = jnp.bfloat16 if use_bf16 else jnp.float32

    rows2 = N * C * Ho
    x_pairs = x_nchw.reshape(rows2, 2 * W)                    # free view (row pairs)
    cho = C * Ho
    img_bytes = C * HW * itemsize

    if cho <= MAX_BLOCK_ROWS:
        # Blocks are whole images -> the per-row scale/bias pattern is identical
        # for every block: a single small resident (tr2, 1) array per parameter.
        bn_img = max(1, min(N, max(1, TARGET_BLOCK_BYTES // img_bytes),
                            MAX_BLOCK_ROWS // cho))
        tr2 = bn_img * cho
        if tr2 % 8 != 0:
            bn_img, tr2 = N, rows2
        rs_rows = jnp.tile(jnp.repeat(scale, Ho), bn_img).reshape(tr2, 1)
        rb_rows = jnp.tile(jnp.repeat(bias, Ho), bn_img).reshape(tr2, 1)
        sb_index = lambda i: (0, 0)                           # resident, loaded once
    else:
        # TODO(synk): very large C*Ho -> stream full-length per-row params instead.
        tr2 = _legal_rows(min(MAX_BLOCK_ROWS, rows2), rows2)
        rs_rows = jnp.tile(jnp.repeat(scale, Ho), N).reshape(rows2, 1)
        rb_rows = jnp.tile(jnp.repeat(bias, Ho), N).reshape(rows2, 1)
        sb_index = lambda i: (i, 0)
    grid2 = pl.cdiv(rows2, tr2)

    # Constant 2x2 average-pool matrix over a (2-row, W)-pair lane layout:
    # column j picks lanes {2j, 2j+1, W+2j, W+2j+1} with weight 0.25.
    lane = jnp.arange(2 * W)[:, None]
    pool_mat = 0.25 * ((lane % W) // 2 == jnp.arange(Wo)[None, :]).astype(jnp.float32)

    pooled = pl.pallas_call(
        _bn_relu_pool_kernel,
        out_shape=jax.ShapeDtypeStruct((rows2, Wo), pooled_dtype),
        grid=(grid2,),
        in_specs=[pl.BlockSpec((tr2, 2 * W), lambda i: (i, 0)),
                  pl.BlockSpec((tr2, 1), sb_index),
                  pl.BlockSpec((tr2, 1), sb_index),
                  pl.BlockSpec((2 * W, Wo), lambda i: (0, 0))],
        out_specs=pl.BlockSpec((tr2, Wo), lambda i: (i, 0)),
        compiler_params=pltpu.CompilerParams(
            dimension_semantics=("parallel",),
            vmem_limit_bytes=VMEM_LIMIT_BYTES),
        cost_estimate=pl.CostEstimate(
            flops=3 * rows2 * 2 * W + 2 * rows2 * 2 * W * Wo,
            transcendentals=0,
            bytes_accessed=rows2 * 2 * W * itemsize
                           + rows2 * Wo * jnp.dtype(pooled_dtype).itemsize),
    )(x_pairs, rs_rows, rb_rows, pool_mat)

    # ---------------- pass 2b: 1x1 conv, NCHW output directly ----------------
    pooled3 = pooled.reshape(N, C, P)                         # free view
    w2 = conv_w.reshape(C_out, C).astype(pooled_dtype)        # pre-cast (bf16 if C>=128)

    img2_bytes = C * P * jnp.dtype(pooled_dtype).itemsize
    bn2 = max(1, min(N, 16, max(1, CONV_BLOCK_BYTES // img2_bytes)))
    grid3 = pl.cdiv(N, bn2)

    out = pl.pallas_call(
        functools.partial(_conv1x1_kernel, n_img=bn2),
        out_shape=jax.ShapeDtypeStruct((N, C_out, P), out_dtype),
        grid=(grid3,),
        in_specs=[pl.BlockSpec((bn2, C, P), lambda i: (i, 0, 0)),
                  pl.BlockSpec((C_out, C), lambda i: (0, 0))],
        out_specs=pl.BlockSpec((bn2, C_out, P), lambda i: (i, 0, 0)),
        compiler_params=pltpu.CompilerParams(
            dimension_semantics=("parallel",),
            vmem_limit_bytes=VMEM_LIMIT_BYTES),
        cost_estimate=pl.CostEstimate(
            flops=2 * N * C_out * C * P, transcendentals=0,
            bytes_accessed=N * C * P * jnp.dtype(pooled_dtype).itemsize
                           + N * C_out * P * jnp.dtype(out_dtype).itemsize
                           + C_out * C * jnp.dtype(pooled_dtype).itemsize),
    )(pooled3, w2)

    return out.reshape(N, C_out, Ho, Wo)                      # free view -> NCHW


# --------------------------------------------------------------------------
# Pure-JAX reference (matches the PyTorch forward in training mode)
# --------------------------------------------------------------------------
def _reference(x, gamma, beta, conv_w):
    mean = x.mean(axis=(0, 2, 3), keepdims=True)
    var = ((x - mean) ** 2).mean(axis=(0, 2, 3), keepdims=True)
    xn = (x - mean) / jnp.sqrt(var + EPS)
    xn = xn * gamma.reshape(1, -1, 1, 1) + beta.reshape(1, -1, 1, 1)
    xr = jnp.maximum(xn, 0.0)
    w = conv_w.reshape(conv_w.shape[0], conv_w.shape[1])
    y = jnp.einsum('nchw,oc->nohw', xr, w)
    N, Co, H, W = y.shape
    return y.reshape(N, Co, H // 2, 2, W // 2, 2).mean(axis=(3, 5))


if __name__ == "__main__":
    n_inpch, n_otpch = 4, 2
    N, H, W = 2, 16, 16

    key = jax.random.PRNGKey(0)
    kx, kw = jax.random.split(key)

    x = jax.random.normal(kx, (N, n_inpch, H, W), dtype=jnp.float32)

    # nn.BatchNorm2d default affine params
    gamma = jnp.ones((n_inpch,), jnp.float32)
    beta = jnp.zeros((n_inpch,), jnp.float32)

    # nn.Conv2d default init: U(-1/sqrt(fan_in), 1/sqrt(fan_in))
    bound = 1.0 / math.sqrt(n_inpch)
    conv_w = jax.random.uniform(kw, (n_otpch, n_inpch, 1, 1),
                                dtype=jnp.float32, minval=-bound, maxval=bound)

    out = dn_transition_block(x, gamma, beta, conv_w)
    out = jax.block_until_ready(out)

    ref = _reference(x, gamma, beta, conv_w)
    assert out.shape == (N, n_otpch, H // 2, W // 2), out.shape
    assert jnp.allclose(out, ref, atol=1e-4, rtol=1e-4), \
        float(jnp.max(jnp.abs(out - ref)))

    print("KERNEL_OK")
</pallas_src>

<mosaic_0001>
module attributes {stable_mosaic.version = 11 : i64} {
  func.func @_stats_kernel(%arg0: i32, %arg1: memref<8x256xf32, #tpu.memory_space<vmem>>, %arg2: memref<8x1xf32, #tpu.memory_space<vmem>>, %arg3: memref<8x1xf32, #tpu.memory_space<vmem>>) attributes {dimension_semantics = [#tpu.dimension_semantics<parallel>], iteration_bounds = array<i64: 1>, scalar_prefetch = 0 : i64, scratch_operands = 0 : i64, tpu.core_type = #tpu.core_type<tc>, window_params = [{transform_indices = @transform_0, window_bounds = array<i64: 8, 256>}, {transform_indices = @transform_1, window_bounds = array<i64: 8, 1>}, {transform_indices = @transform_2, window_bounds = array<i64: 8, 1>}]} {
    %c0 = arith.constant 0 : index
    %c0_0 = arith.constant 0 : index
    %0 = vector.load %arg1[%c0, %c0_0] : memref<8x256xf32, #tpu.memory_space<vmem>>, vector<8x256xf32>
    %cst = arith.constant dense<0.000000e+00> : vector<8xf32>
    %1 = vector.multi_reduction <add>, %0, %cst [1] : vector<8x256xf32> to vector<8xf32>
    %2 = vector.shape_cast %1 : vector<8xf32> to vector<8x1xf32>
    %c0_1 = arith.constant 0 : index
    %c0_2 = arith.constant 0 : index
    %3 = vector.load %arg2[%c0_1, %c0_2] : memref<8x1xf32, #tpu.memory_space<vmem>>, vector<8x1xf32>
    tpu.vector_store %arg2[%c0_1, %c0_2], %2 {strides = array<i32>} : memref<8x1xf32, #tpu.memory_space<vmem>>, vector<8x1xf32>,
    %4 = arith.mulf %0, %0 : vector<8x256xf32>
    %cst_3 = arith.constant dense<0.000000e+00> : vector<8xf32>
    %5 = vector.multi_reduction <add>, %4, %cst_3 [1] : vector<8x256xf32> to vector<8xf32>
    %6 = vector.shape_cast %5 : vector<8xf32> to vector<8x1xf32>
    %c0_4 = arith.constant 0 : index
    %c0_5 = arith.constant 0 : index
    %7 = vector.load %arg3[%c0_4, %c0_5] : memref<8x1xf32, #tpu.memory_space<vmem>>, vector<8x1xf32>
    tpu.vector_store %arg3[%c0_4, %c0_5], %6 {strides = array<i32>} : memref<8x1xf32, #tpu.memory_space<vmem>>, vector<8x1xf32>,
    return
  }
  func.func @transform_0(%arg0: i32) -> (i32, i32) {
    %c0_i32 = arith.constant 0 : i32
    %c0_i32_0 = arith.constant 0 : i32
    return %arg0, %c0_i32 : i32, i32
  }
  func.func @transform_1(%arg0: i32) -> (i32, i32) {
    %c0_i32 = arith.constant 0 : i32
    %c0_i32_0 = arith.constant 0 : i32
    return %arg0, %c0_i32 : i32, i32
  }
  func.func @transform_2(%arg0: i32) -> (i32, i32) {
    %c0_i32 = arith.constant 0 : i32
    %c0_i32_0 = arith.constant 0 : i32
    return %arg0, %c0_i32 : i32, i32
  }
}

module attributes {stable_mosaic.version = 11 : i64} {
  func.func @_bn_relu_pool_kernel(%arg0: i32, %arg1: memref<64x32xf32, #tpu.memory_space<vmem>>, %arg2: memref<64x1xf32, #tpu.memory_space<vmem>>, %arg3: memref<64x1xf32, #tpu.memory_space<vmem>>, %arg4: memref<32x8xf32, #tpu.memory_space<vmem>>, %arg5: memref<64x8xf32, #tpu.memory_space<vmem>>) attributes {dimension_semantics = [#tpu.dimension_semantics<parallel>], iteration_bounds = array<i64: 1>, scalar_prefetch = 0 : i64, scratch_operands = 0 : i64, tpu.core_type = #tpu.core_type<tc>, window_params = [{transform_indices = @transform_0, window_bounds = array<i64: 64, 32>}, {pipeline_mode = #tpu.pipeline_mode<synchronous>, transform_indices = @transform_1, window_bounds = array<i64: 64, 1>}, {pipeline_mode = #tpu.pipeline_mode<synchronous>, transform_indices = @transform_2, window_bounds = array<i64: 64, 1>}, {pipeline_mode = #tpu.pipeline_mode<synchronous>, transform_indices = @transform_3, window_bounds = array<i64: 32, 8>}, {transform_indices = @transform_4, window_bounds = array<i64: 64, 8>}]} {
    %c0 = arith.constant 0 : index
    %c0_0 = arith.constant 0 : index
    %0 = vector.load %arg1[%c0, %c0_0] : memref<64x32xf32, #tpu.memory_space<vmem>>, vector<64x32xf32>
    %c0_1 = arith.constant 0 : index
    %c0_2 = arith.constant 0 : index
    %1 = vector.load %arg2[%c0_1, %c0_2] : memref<64x1xf32, #tpu.memory_space<vmem>>, vector<64x1xf32>
    %2 = vector.broadcast %1 : vector<64x1xf32> to vector<64x32xf32>
    %3 = arith.mulf %0, %2 : vector<64x32xf32>
    %c0_3 = arith.constant 0 : index
    %c0_4 = arith.constant 0 : index
    %4 = vector.load %arg3[%c0_3, %c0_4] : memref<64x1xf32, #tpu.memory_space<vmem>>, vector<64x1xf32>
    %5 = vector.broadcast %4 : vector<64x1xf32> to vector<64x32xf32>
    %6 = arith.addf %3, %5 : vector<64x32xf32>
    %cst = arith.constant 0.000000e+00 : f32
    %7 = vector.broadcast %cst : f32 to vector<64x32xf32>
    %8 = arith.maximumf %6, %7 : vector<64x32xf32>
    %c0_5 = arith.constant 0 : index
    %c0_6 = arith.constant 0 : index
    %9 = vector.load %arg4[%c0_5, %c0_6] : memref<32x8xf32, #tpu.memory_space<vmem>>, vector<32x8xf32>
    %cst_7 = arith.constant dense<0.000000e+00> : vector<64x8xf32>
    %10 = tpu.matmul %8, %9, %cst_7 {dimension_numbers = #tpu.dot_dimension_numbers<[1], [0], [0], [1], [0, 0, 1, 1], [], []>} : vector<64x32xf32>, vector<32x8xf32>, vector<64x8xf32> -> vector<64x8xf32>
    %c0_8 = arith.constant 0 : index
    %c0_9 = arith.constant 0 : index
    %11 = vector.load %arg5[%c0_8, %c0_9] : memref<64x8xf32, #tpu.memory_space<vmem>>, vector<64x8xf32>
    tpu.vector_store %arg5[%c0_8, %c0_9], %10 {strides = array<i32>} : memref<64x8xf32, #tpu.memory_space<vmem>>, vector<64x8xf32>,
    return
  }
  func.func @transform_0(%arg0: i32) -> (i32, i32) {
    %c0_i32 = arith.constant 0 : i32
    %c0_i32_0 = arith.constant 0 : i32
    return %arg0, %c0_i32 : i32, i32
  }
  func.func @transform_1(%arg0: i32) -> (i32, i32) {
    %c0_i32 = arith.constant 0 : i32
    %c0_i32_0 = arith.constant 0 : i32
    %c0_i32_1 = arith.constant 0 : i32
    return %c0_i32, %c0_i32_0 : i32, i32
  }
  func.func @transform_2(%arg0: i32) -> (i32, i32) {
    %c0_i32 = arith.constant 0 : i32
    %c0_i32_0 = arith.constant 0 : i32
    %c0_i32_1 = arith.constant 0 : i32
    return %c0_i32, %c0_i32_0 : i32, i32
  }
  func.func @transform_3(%arg0: i32) -> (i32, i32) {
    %c0_i32 = arith.constant 0 : i32
    %c0_i32_0 = arith.constant 0 : i32
    %c0_i32_1 = arith.constant 0 : i32
    return %c0_i32, %c0_i32_0 : i32, i32
  }
  func.func @transform_4(%arg0: i32) -> (i32, i32) {
    %c0_i32 = arith.constant 0 : i32
    %c0_i32_0 = arith.constant 0 : i32
    return %arg0, %c0_i32 : i32, i32
  }
}

module attributes {stable_mosaic.version = 11 : i64} {
  func.func @_conv1x1_kernel(%arg0: i32, %arg1: memref<2x4x64xf32, #tpu.memory_space<vmem>>, %arg2: memref<2x4xf32, #tpu.memory_space<vmem>>, %arg3: memref<2x2x64xf32, #tpu.memory_space<vmem>>) attributes {dimension_semantics = [#tpu.dimension_semantics<parallel>], iteration_bounds = array<i64: 1>, scalar_prefetch = 0 : i64, scratch_operands = 0 : i64, tpu.core_type = #tpu.core_type<tc>, window_params = [{transform_indices = @transform_0, window_bounds = array<i64: 2, 4, 64>}, {pipeline_mode = #tpu.pipeline_mode<synchronous>, transform_indices = @transform_1, window_bounds = array<i64: 2, 4>}, {transform_indices = @transform_2, window_bounds = array<i64: 2, 2, 64>}]} {
    %c0 = arith.constant 0 : index
    %c0_0 = arith.constant 0 : index
    %0 = vector.load %arg2[%c0, %c0_0] : memref<2x4xf32, #tpu.memory_space<vmem>>, vector<2x4xf32>
    %c0_1 = arith.constant 0 : index
    %c0_2 = arith.constant 0 : index
    %c0_3 = arith.constant 0 : index
    %1 = vector.load %arg1[%c0_1, %c0_2, %c0_3] : memref<2x4x64xf32, #tpu.memory_space<vmem>>, vector<1x4x64xf32>
    %2 = vector.shape_cast %1 : vector<1x4x64xf32> to vector<4x64xf32>
    %cst = arith.constant dense<0.000000e+00> : vector<2x64xf32>
    %3 = tpu.matmul %0, %2, %cst {dimension_numbers = #tpu.dot_dimension_numbers<[1], [0], [0], [1], [0, 0, 1, 1], [], []>} : vector<2x4xf32>, vector<4x64xf32>, vector<2x64xf32> -> vector<2x64xf32>
    %c0_4 = arith.constant 0 : index
    %c0_5 = arith.constant 0 : index
    %c0_6 = arith.constant 0 : index
    %4 = vector.load %arg3[%c0_4, %c0_5, %c0_6] : memref<2x2x64xf32, #tpu.memory_space<vmem>>, vector<1x2x64xf32>
    %5 = vector.shape_cast %4 : vector<1x2x64xf32> to vector<2x64xf32>
    %6 = vector.shape_cast %3 : vector<2x64xf32> to vector<1x2x64xf32>
    tpu.vector_store %arg3[%c0_4, %c0_5, %c0_6], %6 {strides = array<i32>} : memref<2x2x64xf32, #tpu.memory_space<vmem>>, vector<1x2x64xf32>,
    %c1 = arith.constant 1 : index
    %c0_7 = arith.constant 0 : index
    %c0_8 = arith.constant 0 : index
    %7 = vector.load %arg1[%c1, %c0_7, %c0_8] : memref<2x4x64xf32, #tpu.memory_space<vmem>>, vector<1x4x64xf32>
    %8 = vector.shape_cast %7 : vector<1x4x64xf32> to vector<4x64xf32>
    %cst_9 = arith.constant dense<0.000000e+00> : vector<2x64xf32>
    %9 = tpu.matmul %0, %8, %cst_9 {dimension_numbers = #tpu.dot_dimension_numbers<[1], [0], [0], [1], [0, 0, 1, 1], [], []>} : vector<2x4xf32>, vector<4x64xf32>, vector<2x64xf32> -> vector<2x64xf32>
    %c1_10 = arith.constant 1 : index
    %c0_11 = arith.constant 0 : index
    %c0_12 = arith.constant 0 : index
    %10 = vector.load %arg3[%c1_10, %c0_11, %c0_12] : memref<2x2x64xf32, #tpu.memory_space<vmem>>, vector<1x2x64xf32>
    %11 = vector.shape_cast %10 : vector<1x2x64xf32> to vector<2x64xf32>
    %12 = vector.shape_cast %9 : vector<2x64xf32> to vector<1x2x64xf32>
    tpu.vector_store %arg3[%c1_10, %c0_11, %c0_12], %12 {strides = array<i32>} : memref<2x2x64xf32, #tpu.memory_space<vmem>>, vector<1x2x64xf32>,
    return
  }
  func.func @transform_0(%arg0: i32) -> (i32, i32, i32) {
    %c0_i32 = arith.constant 0 : i32
    %c0_i32_0 = arith.constant 0 : i32
    %c0_i32_1 = arith.constant 0 : i32
    return %arg0, %c0_i32, %c0_i32_0 : i32, i32, i32
  }
  func.func @transform_1(%arg0: i32) -> (i32, i32) {
    %c0_i32 = arith.constant 0 : i32
    %c0_i32_0 = arith.constant 0 : i32
    %c0_i32_1 = arith.constant 0 : i32
    return %c0_i32, %c0_i32_0 : i32, i32
  }
  func.func @transform_2(%arg0: i32) -> (i32, i32, i32) {
    %c0_i32 = arith.constant 0 : i32
    %c0_i32_0 = arith.constant 0 : i32
    %c0_i32_1 = arith.constant 0 : i32
    return %arg0, %c0_i32, %c0_i32_0 : i32, i32, i32
  }
}

</mosaic_0001>

<bundles_post_ra>
// kernel: tile.13
= control target key start
LH: loop header
LB: loop body
LE: loop exit
PB: predicated region body
PF: predicated region fallthrough
CT: control target
= control target key end

     0   :  { %vm7_vm0 = vcmask 64512   ;;  %s37_s8 = smov 8   ;;  %s38_s9 = smov 16   ;;  %vm13_vm1 = vcmask 261312   ;;  %vm19_vm2 = vcmask 195712   ;;  %vm25_vm3 = vcmask 130112   ;;  %s55_s0 = inlined_call_operand.vmem [shape: f32[4,8], index: 0, kind: input, shape index: {}]   ;;  %s56_s1 = inlined_call_operand.vmem [shape: f32[32], index: 1, kind: output, shape index: {}]  }
   0x1   :  { %v4_v0 = vld [vmem:[%s55_s0] sm:$0xf]  ;;  %s36_s0 = smov 24  }
   0x2   :  { %5 = vst [vmem:[#allocation1] sm:$0xf] %v4_v0 }
   0x9   :  { %v10_v1 = vld [vmem:[#allocation1 + $0x3] sm:$0x1]   ;;  %v22_v2 = vld [vmem:[#allocation1 + $0x1] sm:$0x1]   ;;  %v6_v3 = vld [vmem:[#allocation1] sm:$0x1]  }
   0xa   :  { %11 = vrot.lane.b32.xlu0 %v10_v1, %s36_s0  ;;  %23 = vrot.lane.b32.xlu1 %v22_v2, %s37_s8  ;;  %v16_v4 = vld [vmem:[#allocation1 + $0x2] sm:$0x1]   ;;  %8 = vst.msk [vmem:[#allocation0] sm:$0x1] %vm7_vm0, %v6_v3  }
   0xe   :  { %17 = vrot.lane.b32.xlu0 %v16_v4, %s38_s9 }
  0x7c   :  { %v12_v5 = vpop.permute.xlu0 %11   ;;  %v24_v6 = vpop.permute.xlu1 %23  }
  0x7d   :  { %14 = vst.msk [vmem:[#allocation0] sm:$0x1] %vm13_vm1, %v12_v5  }
  0x80   :  { %v18_v7 = vpop.permute.xlu0 %17  }
  0x81   :  { %20 = vst.msk [vmem:[#allocation0] sm:$0x1] %vm19_vm2, %v18_v7  }
  0x82   :  { %26 = vst.msk [vmem:[#allocation0] sm:$0x1] %vm25_vm3, %v24_v6  }
  0x89   :  { %v30_v8 = vld [vmem:[#allocation0] sm:$0x1] }
  0x8a   :  { %32 = vst [vmem:[%s56_s1] sm:$0x1] %v30_v8 }

// kernel: tile.14
= control target key start
LH: loop header
LB: loop body
LE: loop exit
PB: predicated region body
PF: predicated region fallthrough
CT: control target
= control target key end

     0   :  { %s22_s0 = inlined_call_operand.vmem [shape: f32[32], index: 0, kind: input, shape index: {}]   ;;  %s23_s1 = inlined_call_operand.vmem [shape: f32[2,32], index: 1, kind: output, shape index: {}]  }
   0x1   :  { %v4_v0 = vld [vmem:[%s22_s0] ss:$0 sm:$0xff] }
   0x2   :  { %5 = vst [vmem:[%s23_s1] sm:$0x3] %v4_v0 }

// kernel: tile.0
= control target key start
LH: loop header
LB: loop body
LE: loop exit
PB: predicated region body
PF: predicated region fallthrough
CT: control target
= control target key end

     0   :  { %s354_s8 = smov 125   ;;  %s355_s9 = smov 126   ;;  %vm7_vm0 = vcmask 7168   ;;  %s653_s0 = inlined_call_operand.vmem [shape: f32[2,32], index: 0, kind: input, shape index: {}]   ;;  %s654_s1 = inlined_call_operand.vmem [shape: f32[64,1], index: 1, kind: output, shape index: {}]  }
   0x1   :  { %v4_v0 = vld [vmem:[%s653_s0] sm:$0x3]  ;;  %s353_s0 = smov 127   ;;  %s356_s10 = smov 124  }
   0x2   :  { %5 = vst [vmem:[#allocation0] sm:$0x3] %v4_v0  ;;  %s357_s11 = smov 123   ;;  %s358_s12 = smov 122  }
   0x3   :  { %s359_s13 = smov 121   ;;  %s360_s14 = smov 120  }
   0x4   :  { %s361_s15 = smov 119   ;;  %s362_s16 = smov 118  }
   0x5   :  { %s363_s17 = smov 117   ;;  %s364_s18 = smov 116  }
   0x6   :  { %s365_s19 = smov 115   ;;  %s366_s20 = smov 114  }
   0x7   :  { %s367_s21 = smov 113   ;;  %s368_s22 = smov 112  }
   0x8   :  { %s369_s23 = smov 111   ;;  %s370_s24 = smov 110  }
   0x9   :  { %v11_v1 = vld [vmem:[#allocation0] sm:$0x3]   ;;  %s371_s25 = smov 109   ;;  %s372_s26 = smov 108  }
   0xa   :  { %v27_v2 = vld [vmem:[#allocation0] sm:$0x3]   ;;  %12 = vrot.lane.b32.xlu0 %v11_v1, %s353_s0  ;;  %s373_s27 = smov 107   ;;  %s374_s28 = smov 106  }
   0xb   :  { %28 = vrot.lane.b32.xlu1 %v27_v2, %s354_s8  ;;  %v19_v3 = vld [vmem:[#allocation0] sm:$0x3]   ;;  %s375_s29 = smov 105   ;;  %s376_s30 = smov 104  }
   0xc   :  { %v35_v4 = vld [vmem:[#allocation0] sm:$0x3]   ;;  %s377_s6 = smov 103   ;;  %s378_s7 = smov 102  }
   0xd   :  { %v43_v5 = vld [vmem:[#allocation0] sm:$0x3]   ;;  %s379_s0 = smov 101   ;;  %s380_s8 = smov 100  }
   0xe   :  { %20 = vrot.lane.b32.xlu0 %v19_v3, %s355_s9  ;;  %v51_v6 = vld [vmem:[#allocation0] sm:$0x3]   ;;  %s381_s9 = smov 99  }
   0xf   :  { %36 = vrot.lane.b32.xlu1 %v35_v4, %s356_s10  ;;  %v59_v7 = vld [vmem:[#allocation0] sm:$0x3]   ;;  %s382_s10 = smov 98  }
  0x10   :  { %v67_v8 = vld [vmem:[#allocation0] sm:$0x3]  }
  0x11   :  { %v75_v9 = vld [vmem:[#allocation0] sm:$0x3]  }
  0x12   :  { %44 = vrot.lane.b32.xlu0 %v43_v5, %s357_s11  ;;  %v83_v10 = vld [vmem:[#allocation0] sm:$0x3]   ;;  %s383_s11 = smov 97  }
  0x13   :  { %52 = vrot.lane.b32.xlu1 %v51_v6, %s358_s12  ;;  %v91_v11 = vld [vmem:[#allocation0] sm:$0x3]  }
  0x14   :  { %v99_v12 = vld [vmem:[#allocation0] sm:$0x3]  }
  0x15   :  { %v107_v13 = vld [vmem:[#allocation0] sm:$0x3]  }
  0x16   :  { %60 = vrot.lane.b32.xlu0 %v59_v7, %s359_s13  ;;  %v115_v14 = vld [vmem:[#allocation0] sm:$0x3]  }
  0x17   :  { %68 = vrot.lane.b32.xlu1 %v67_v8, %s360_s14  ;;  %v123_v15 = vld [vmem:[#allocation0] sm:$0x3]  }
  0x18   :  { %v131_v16 = vld [vmem:[#allocation0] sm:$0x3]  }
  0x19   :  { %v139_v17 = vld [vmem:[#allocation0] sm:$0x3]  }
  0x1a   :  { %76 = vrot.lane.b32.xlu0 %v75_v9, %s361_s15  ;;  %v147_v18 = vld [vmem:[#allocation0] sm:$0x3]  }
  0x1b   :  { %84 = vrot.lane.b32.xlu1 %v83_v10, %s362_s16  ;;  %v155_v19 = vld [vmem:[#allocation0] sm:$0x3]  }
  0x1c   :  { %v163_v20 = vld [vmem:[#allocation0] sm:$0x3]  }
  0x1d   :  { %v171_v21 = vld [vmem:[#allocation0] sm:$0x3]  }
  0x1e   :  { %92 = vrot.lane.b32.xlu0 %v91_v11, %s363_s17  ;;  %v179_v22 = vld [vmem:[#allocation0] sm:$0x3]  }
  0x1f   :  { %100 = vrot.lane.b32.xlu1 %v99_v12, %s364_s18  ;;  %v187_v23 = vld [vmem:[#allocation0] sm:$0x3]  }
  0x20   :  { %v195_v24 = vld [vmem:[#allocation0] sm:$0x3]  }
  0x21   :  { %v203_v25 = vld [vmem:[#allocation0] sm:$0x3]  }
  0x22   :  { %108 = vrot.lane.b32.xlu0 %v107_v13, %s365_s19  ;;  %v211_v26 = vld [vmem:[#allocation0] sm:$0x3]  }
  0x23   :  { %116 = vrot.lane.b32.xlu1 %v115_v14, %s366_s20  ;;  %v6_v27 = vld [vmem:[#allocation0] sm:$0x3]  }
  0x24   :  { %8 = vst.msk [vmem:[%s654_s1] sm:$0x1] %vm7_vm0, %v6_v27   ;;  %259 = vst.msk [vmem:[%s654_s1 + $0x1f] sm:$0x2] %vm7_vm0, %v6_v27   ;;  %v219_v28 = vld [vmem:[#allocation0] sm:$0x3]  }
  0x25   :  { %v227_v29 = vld [vmem:[#allocation0] sm:$0x3]  }
  0x26   :  { %124 = vrot.lane.b32.xlu0 %v123_v15, %s367_s21  ;;  %v235_v30 = vld [vmem:[#allocation0] sm:$0x3]  }
  0x27   :  { %132 = vrot.lane.b32.xlu1 %v131_v16, %s368_s22  ;;  %v243_v31 = vld [vmem:[#allocation0] sm:$0x3]  }
  0x28   :  { %v251_v32 = vld [vmem:[#allocation0] sm:$0x3]  }
  0x2a   :  { %140 = vrot.lane.b32.xlu0 %v139_v17, %s369_s23 }
  0x2b   :  { %148 = vrot.lane.b32.xlu1 %v147_v18, %s370_s24 }
  0x2e   :  { %156 = vrot.lane.b32.xlu0 %v155_v19, %s371_s25 }
  0x2f   :  { %164 = vrot.lane.b32.xlu1 %v163_v20, %s372_s26 }
  0x32   :  { %172 = vrot.lane.b32.xlu0 %v171_v21, %s373_s27 }
  0x33   :  { %180 = vrot.lane.b32.xlu1 %v179_v22, %s374_s28 }
  0x36   :  { %188 = vrot.lane.b32.xlu0 %v187_v23, %s375_s29 }
  0x37   :  { %196 = vrot.lane.b32.xlu1 %v195_v24, %s376_s30 }
  0x3a   :  { %204 = vrot.lane.b32.xlu0 %v203_v25, %s377_s6 }
  0x3b   :  { %212 = vrot.lane.b32.xlu1 %v211_v26, %s378_s7 }
  0x3e   :  { %220 = vrot.lane.b32.xlu0 %v219_v28, %s379_s0 }
  0x3f   :  { %228 = vrot.lane.b32.xlu1 %v227_v29, %s380_s8 }
  0x42   :  { %236 = vrot.lane.b32.xlu0 %v235_v30, %s381_s9 }
  0x43   :  { %244 = vrot.lane.b32.xlu1 %v243_v31, %s382_s10 }
  0x46   :  { %252 = vrot.lane.b32.xlu0 %v251_v32, %s383_s11 }
  0x7c   :  { %v13_v33 = vpop.permute.xlu0 %12  }
  0x7d   :  { %v29_v34 = vpop.permute.xlu1 %28   ;;  %260 = vst.msk [vmem:[%s654_s1 + $0x1] sm:$0x1] %vm7_vm0, %v13_v33   ;;  %261 = vst.msk [vmem:[%s654_s1 + $0x20] sm:$0x2] %vm7_vm0, %v13_v33  }
  0x7e   :  { %264 = vst.msk [vmem:[%s654_s1 + $0x3] sm:$0x1] %vm7_vm0, %v29_v34   ;;  %265 = vst.msk [vmem:[%s654_s1 + $0x22] sm:$0x2] %vm7_vm0, %v29_v34  }
  0x80   :  { %v21_v35 = vpop.permute.xlu0 %20  }
  0x81   :  { %v37_v36 = vpop.permute.xlu1 %36   ;;  %262 = vst.msk [vmem:[%s654_s1 + $0x2] sm:$0x1] %vm7_vm0, %v21_v35   ;;  %263 = vst.msk [vmem:[%s654_s1 + $0x21] sm:$0x2] %vm7_vm0, %v21_v35  }
  0x82   :  { %266 = vst.msk [vmem:[%s654_s1 + $0x4] sm:$0x1] %vm7_vm0, %v37_v36   ;;  %267 = vst.msk [vmem:[%s654_s1 + $0x23] sm:$0x2] %vm7_vm0, %v37_v36  }
  0x84   :  { %v45_v37 = vpop.permute.xlu0 %44  }
  0x85   :  { %v53_v38 = vpop.permute.xlu1 %52   ;;  %268 = vst.msk [vmem:[%s654_s1 + $0x5] sm:$0x1] %vm7_vm0, %v45_v37   ;;  %269 = vst.msk [vmem:[%s654_s1 + $0x24] sm:$0x2] %vm7_vm0, %v45_v37  }
  0x86   :  { %270 = vst.msk [vmem:[%s654_s1 + $0x6] sm:$0x1] %vm7_vm0, %v53_v38   ;;  %271 = vst.msk [vmem:[%s654_s1 + $0x25] sm:$0x2] %vm7_vm0, %v53_v38  }
  0x88   :  { %v61_v39 = vpop.permute.xlu0 %60  }
  0x89   :  { %v69_v40 = vpop.permute.xlu1 %68   ;;  %272 = vst.msk [vmem:[%s654_s1 + $0x7] sm:$0x1] %vm7_vm0, %v61_v39   ;;  %273 = vst.msk [vmem:[%s654_s1 + $0x26] sm:$0x2] %vm7_vm0, %v61_v39  }
  0x8a   :  { %274 = vst.msk [vmem:[%s654_s1 + $0x8] sm:$0x1] %vm7_vm0, %v69_v40   ;;  %275 = vst.msk [vmem:[%s654_s1 + $0x27] sm:$0x2] %vm7_vm0, %v69_v40  }
  0x8c   :  { %v77_v41 = vpop.permute.xlu0 %76  }
  0x8d   :  { %v85_v42 = vpop.permute.xlu1 %84   ;;  %276 = vst.msk [vmem:[%s654_s1 + $0x9] sm:$0x1] %vm7_vm0, %v77_v41   ;;  %277 = vst.msk [vmem:[%s654_s1 + $0x28] sm:$0x2] %vm7_vm0, %v77_v41  }
  0x8e   :  { %278 = vst.msk [vmem:[%s654_s1 + $0xa] sm:$0x1] %vm7_vm0, %v85_v42   ;;  %279 = vst.msk [vmem:[%s654_s1 + $0x29] sm:$0x2] %vm7_vm0, %v85_v42  }
  0x90   :  { %v93_v43 = vpop.permute.xlu0 %92  }
  0x91   :  { %v101_v44 = vpop.permute.xlu1 %100   ;;  %280 = vst.msk [vmem:[%s654_s1 + $0xb] sm:$0x1] %vm7_vm0, %v93_v43   ;;  %281 = vst.msk [vmem:[%s654_s1 + $0x2a] sm:$0x2] %vm7_vm0, %v93_v43  }
  0x92   :  { %282 = vst.msk [vmem:[%s654_s1 + $0xc] sm:$0x1] %vm7_vm0, %v101_v44   ;;  %283 = vst.msk [vmem:[%s654_s1 + $0x2b] sm:$0x2] %vm7_vm0, %v101_v44  }
  0x94   :  { %v109_v45 = vpop.permute.xlu0 %108  }
  0x95   :  { %v117_v46 = vpop.permute.xlu1 %116   ;;  %284 = vst.msk [vmem:[%s654_s1 + $0xd] sm:$0x1] %vm7_vm0, %v109_v45   ;;  %285 = vst.msk [vmem:[%s654_s1 + $0x2c] sm:$0x2] %vm7_vm0, %v109_v45  }
  0x96   :  { %286 = vst.msk [vmem:[%s654_s1 + $0xe] sm:$0x1] %vm7_vm0, %v117_v46   ;;  %287 = vst.msk [vmem:[%s654_s1 + $0x2d] sm:$0x2] %vm7_vm0, %v117_v46  }
  0x98   :  { %v125_v47 = vpop.permute.xlu0 %124  }
  0x99   :  { %v133_v48 = vpop.permute.xlu1 %132   ;;  %288 = vst.msk [vmem:[%s654_s1 + $0xf] sm:$0x1] %vm7_vm0, %v125_v47   ;;  %289 = vst.msk [vmem:[%s654_s1 + $0x2e] sm:$0x2] %vm7_vm0, %v125_v47  }
  0x9a   :  { %290 = vst.msk [vmem:[%s654_s1 + $0x10] sm:$0x1] %vm7_vm0, %v133_v48   ;;  %291 = vst.msk [vmem:[%s654_s1 + $0x2f] sm:$0x2] %vm7_vm0, %v133_v48  }
  0x9c   :  { %v141_v49 = vpop.permute.xlu0 %140  }
  0x9d   :  { %v149_v50 = vpop.permute.xlu1 %148   ;;  %292 = vst.msk [vmem:[%s654_s1 + $0x11] sm:$0x1] %vm7_vm0, %v141_v49   ;;  %293 = vst.msk [vmem:[%s654_s1 + $0x30] sm:$0x2] %vm7_vm0, %v141_v49  }
  0x9e   :  { %294 = vst.msk [vmem:[%s654_s1 + $0x12] sm:$0x1] %vm7_vm0, %v149_v50   ;;  %295 = vst.msk [vmem:[%s654_s1 + $0x31] sm:$0x2] %vm7_vm0, %v149_v50  }
  0xa0   :  { %v157_v51 = vpop.permute.xlu0 %156  }
  0xa1   :  { %v165_v52 = vpop.permute.xlu1 %164   ;;  %296 = vst.msk [vmem:[%s654_s1 + $0x13] sm:$0x1] %vm7_vm0, %v157_v51   ;;  %297 = vst.msk [vmem:[%s654_s1 + $0x32] sm:$0x2] %vm7_vm0, %v157_v51  }
  0xa2   :  { %298 = vst.msk [vmem:[%s654_s1 + $0x14] sm:$0x1] %vm7_vm0, %v165_v52   ;;  %299 = vst.msk [vmem:[%s654_s1 + $0x33] sm:$0x2] %vm7_vm0, %v165_v52  }
  0xa4   :  { %v173_v53 = vpop.permute.xlu0 %172  }
  0xa5   :  { %v181_v54 = vpop.permute.xlu1 %180   ;;  %300 = vst.msk [vmem:[%s654_s1 + $0x15] sm:$0x1] %vm7_vm0, %v173_v53   ;;  %301 = vst.msk [vmem:[%s654_s1 + $0x34] sm:$0x2] %vm7_vm0, %v173_v53  }
  0xa6   :  { %302 = vst.msk [vmem:[%s654_s1 + $0x16] sm:$0x1] %vm7_vm0, %v181_v54   ;;  %303 = vst.msk [vmem:[%s654_s1 + $0x35] sm:$0x2] %vm7_vm0, %v181_v54  }
  0xa8   :  { %v189_v55 = vpop.permute.xlu0 %188  }
  0xa9   :  { %v197_v56 = vpop.permute.xlu1 %196   ;;  %304 = vst.msk [vmem:[%s654_s1 + $0x17] sm:$0x1] %vm7_vm0, %v189_v55   ;;  %305 = vst.msk [vmem:[%s654_s1 + $0x36] sm:$0x2] %vm7_vm0, %v189_v55  }
  0xaa   :  { %306 = vst.msk [vmem:[%s654_s1 + $0x18] sm:$0x1] %vm7_vm0, %v197_v56   ;;  %307 = vst.msk [vmem:[%s654_s1 + $0x37] sm:$0x2] %vm7_vm0, %v197_v56  }
  0xac   :  { %v205_v57 = vpop.permute.xlu0 %204  }
  0xad   :  { %v213_v58 = vpop.permute.xlu1 %212   ;;  %308 = vst.msk [vmem:[%s654_s1 + $0x19] sm:$0x1] %vm7_vm0, %v205_v57   ;;  %309 = vst.msk [vmem:[%s654_s1 + $0x38] sm:$0x2] %vm7_vm0, %v205_v57  }
  0xae   :  { %310 = vst.msk [vmem:[%s654_s1 + $0x1a] sm:$0x1] %vm7_vm0, %v213_v58   ;;  %311 = vst.msk [vmem:[%s654_s1 + $0x39] sm:$0x2] %vm7_vm0, %v213_v58  }
  0xb0   :  { %v221_v59 = vpop.permute.xlu0 %220  }
  0xb1   :  { %v229_v60 = vpop.permute.xlu1 %228   ;;  %312 = vst.msk [vmem:[%s654_s1 + $0x1b] sm:$0x1] %vm7_vm0, %v221_v59   ;;  %313 = vst.msk [vmem:[%s654_s1 + $0x3a] sm:$0x2] %vm7_vm0, %v221_v59  }
  0xb2   :  { %314 = vst.msk [vmem:[%s654_s1 + $0x1c] sm:$0x1] %vm7_vm0, %v229_v60   ;;  %315 = vst.msk [vmem:[%s654_s1 + $0x3b] sm:$0x2] %vm7_vm0, %v229_v60  }
  0xb4   :  { %v237_v61 = vpop.permute.xlu0 %236  }
  0xb5   :  { %v245_v62 = vpop.permute.xlu1 %244   ;;  %316 = vst.msk [vmem:[%s654_s1 + $0x1d] sm:$0x1] %vm7_vm0, %v237_v61   ;;  %317 = vst.msk [vmem:[%s654_s1 + $0x3c] sm:$0x2] %vm7_vm0, %v237_v61  }
  0xb6   :  { %318 = vst.msk [vmem:[%s654_s1 + $0x1e] sm:$0x1] %vm7_vm0, %v245_v62   ;;  %319 = vst.msk [vmem:[%s654_s1 + $0x3d] sm:$0x2] %vm7_vm0, %v245_v62  }
  0xb8   :  { %v253_v63 = vpop.permute.xlu0 %252  }
  0xb9   :  { %320 = vst.msk [vmem:[%s654_s1 + $0x1f] sm:$0x1] %vm7_vm0, %v253_v63   ;;  %321 = vst.msk [vmem:[%s654_s1 + $0x3e] sm:$0x2] %vm7_vm0, %v253_v63  }

// kernel: dn_transition_block.3
= control target key start
LH: loop header
LB: loop body
LE: loop exit
PB: predicated region body
PF: predicated region fallthrough
CT: control target
= control target key end

     0   :  { %vm15_vm0 = vcmask 7168   ;;  %s58_s0 = inlined_call_operand.vmem [shape: f32[8,256], index: 0, kind: input, shape index: {}]   ;;  %s59_s1 = inlined_call_operand.vmem [shape: f32[8,1], index: 1, kind: output, shape index: {0}]   ;;  %s60_s2 = inlined_call_operand.vmem [shape: f32[8,1], index: 2, kind: output, shape index: {1}]  }
   0x1   :  { %v10_v0 = vld [vmem:[%s58_s0] sm:$0xff]  ;;  %v11_v1 = vld [vmem:[%s58_s0 + $0x8] sm:$0xff] }
   0x2   :  { %v12_v2 = vadd.f32 %v11_v1, %v10_v0  ;;  %v17_v3 = vmul.f32 %v10_v0, %v10_v0  ;;  %v18_v4 = vmul.f32 %v11_v1, %v11_v1 }
   0x4   :  { %13 = vadd.xlane.f32.xlu0 %v12_v2  ;;  %v19_v5 = vadd.f32 %v18_v4, %v17_v3 }
   0x8   :  { %20 = vadd.xlane.f32.xlu0 %v19_v5 }
  0x91   :  { %v14_v6 = vpop.xlane.xlu0 %13 }
  0x92   :  { %16 = vst.msk [vmem:[%s59_s1] sm:$0xff] %vm15_vm0, %v14_v6 }
  0x95   :  { %v21_v7 = vpop.xlane.xlu0 %20 }
  0x96   :  { %22 = vst.msk [vmem:[%s60_s2] sm:$0xff] %vm15_vm0, %v21_v7 }

// kernel: dn_transition_block.5
= control target key start
LH: loop header
LB: loop body
LE: loop exit
PB: predicated region body
PF: predicated region fallthrough
CT: control target
= control target key end

     0   :  { %vm17_vm0 = vcmask 1043456   ;;  %vm13_vm1 = vcmask 31744   ;;  %v196_v0 = vmov 0.0   ;;  %vm197_vm2 = vmmov 0   ;;  %s228_s0 = inlined_call_operand.vmem [shape: f32[2,4,64], index: 0, kind: input, shape index: {}]   ;;  %s229_s1 = inlined_call_operand.vmem [shape: f32[2,4], index: 1, kind: input, shape index: {}]   ;;  %s230_s2 = inlined_call_operand.vmem [shape: f32[2,2,64], index: 2, kind: output, shape index: {}]  }
   0x1   :  { %184 = vmatprep.subr.mxu0 %v196_v0  ;;  %189 = vmatprep.subr.mxu1 %v196_v0  ;;  %v12_v1 = vld [vmem:[%s228_s0] sm:$0xf]  ;;  %v176_v2 = vld [vmem:[%s228_s0 + $0x4] sm:$0xf]  ;;  %vm91_vm3 = vcmask 517120  }
   0x2   :  { %v11_v3 = vld [vmem:[%s229_s1] sm:$0x3]  ;;  %185 = vmatpush3.msk.msra.mxu0 %vm17_vm0, %v12_v1  ;;  %186 = vmatprep.mubr.msk.f32.mxu0 %vm197_vm2, %v196_v0 }
   0x3   :  { %190 = vmatpush3.msk.msra.mxu1 %vm17_vm0, %v176_v2  ;;  %191 = vmatprep.mubr.msk.f32.mxu1 %vm197_vm2, %v196_v0 }
   0x4   :  { %187 = vmatmul.mubr.msk.f32.vlgmr.msra.gmra.mrb[0].mxu0 %vm13_vm1, %v11_v3  ;;  %192 = vmatmul.mubr.msk.f32.vlgmr.msra.gmra.mrb[0].mxu1 %vm13_vm1, %v11_v3 }
  0xd7   :  { %v87_v4 = vpop.f32.mrb[0].mxu0  ;;  %v164_v5 = vpop.f32.mrb[0].mxu1 }
  0xd8   :  { %92 = vst.msk [vmem:[%s230_s2] sm:$0x3] %vm91_vm3, %v87_v4  ;;  %179 = vst.msk [vmem:[%s230_s2 + $0x2] sm:$0x3] %vm91_vm3, %v164_v5  ;;  %v188_v6 = vpop.f32.mrb[1].mxu0  ;;  %v193_v7 = vpop.f32.mrb[1].mxu1 }

// kernel: dn_transition_block.4
= control target key start
LH: loop header
LB: loop body
LE: loop exit
PB: predicated region body
PF: predicated region fallthrough
CT: control target
= control target key end

     0   :  { %v347_v0 = vmov 0   ;;  %vm149_vm0 = vcmask 261120   ;;  %vm279_vm1 = vcmask 64512   ;;  %s497_s1 = inlined_call_operand.vmem [shape: f32[64,1], index: 1, kind: input, shape index: {}]   ;;  %s498_s2 = inlined_call_operand.vmem [shape: f32[64,1], index: 2, kind: input, shape index: {}]   ;;  %s499_s3 = inlined_call_operand.vmem [shape: f32[32,8], index: 3, kind: input, shape index: {}]   ;;  %s500_s0 = inlined_call_operand.vmem [shape: f32[64,32], index: 0, kind: input, shape index: {}]   ;;  %s501_s4 = inlined_call_operand.vmem [shape: f32[64,8], index: 4, kind: output, shape index: {}]  }
   0x1   :  { %346 = vset.pattern.permute.xlu1 %v347_v0  ;;  %345 = vset.pattern.permute.xlu0 %v347_v0  ;;  %v26_v1 = vld [vmem:[%s497_s1 + $0x8] sm:$0xff]  ;;  %v25_v2 = vld [vmem:[%s497_s1] sm:$0xff]  ;;  %v147_v12 = vld [vmem:[%s499_s3 + $0x10] sm:$0xff] }
   0x2   :  { %40 = vperm.xlu1 %346, %v26_v1   ;;  %35 = vperm.xlu0 %345, %v25_v2   ;;  %v30_v3 = vld [vmem:[%s497_s1 + $0x28] sm:$0xff]  ;;  %v29_v4 = vld [vmem:[%s497_s1 + $0x20] sm:$0xff]  ;;  %v148_v13 = vld [vmem:[%s499_s3 + $0x18] sm:$0xff] }
   0x3   :  { %v85_v5 = vld [vmem:[%s498_s2 + $0x20] sm:$0xff]  ;;  %v146_v8 = vld [vmem:[%s499_s3 + $0x8] sm:$0xff]  ;;  %v336_v14 = vpack.c.bf16 %v148_v13, %v147_v12  ;;  %v31_v15 = vld [vmem:[%s497_s1 + $0x30] sm:$0xff] }
   0x4   :  { %v81_v6 = vld [vmem:[%s498_s2] sm:$0xff]  ;;  %v86_v10 = vld [vmem:[%s498_s2 + $0x28] sm:$0xff]  ;;  %v27_v16 = vld [vmem:[%s497_s1 + $0x10] sm:$0xff] }
   0x5   :  { %v145_v7 = vld [vmem:[%s499_s3] sm:$0xff]  ;;  %v82_v11 = vld [vmem:[%s498_s2 + $0x8] sm:$0xff]  ;;  %v32_v17 = vld [vmem:[%s497_s1 + $0x38] sm:$0xff] }
   0x6   :  { %60 = vperm.xlu1 %346, %v30_v3   ;;  %55 = vperm.xlu0 %345, %v29_v4   ;;  %v332_v9 = vpack.c.bf16 %v146_v8, %v145_v7  ;;  %v28_v18 = vld [vmem:[%s497_s1 + $0x18] sm:$0xff]  ;;  %v87_v19 = vld [vmem:[%s498_s2 + $0x30] sm:$0xff]  ;;  %v17_v25 = vld [vmem:[%s500_s0] sm:$0xff] }
   0x7   :  { %v83_v20 = vld [vmem:[%s498_s2 + $0x10] sm:$0xff]  ;;  %v88_v21 = vld [vmem:[%s498_s2 + $0x38] sm:$0xff]  ;;  %v21_v28 = vld [vmem:[%s500_s0 + $0x20] sm:$0xff] }
   0x8   :  { %333 = vmatprep.subr.bf16.mxu0 %v332_v9  ;;  %340 = vmatprep.subr.bf16.mxu1 %v332_v9  ;;  %v84_v22 = vld [vmem:[%s498_s2 + $0x18] sm:$0xff]  ;;  %v18_v31 = vld [vmem:[%s500_s0 + $0x8] sm:$0xff]  ;;  %v23_v49 = vld [vmem:[%s500_s0 + $0x30] sm:$0xff] }
   0x9   :  { %335 = vmatpush3.bf16.msra.mxu0 %v332_v9  ;;  %342 = vmatpush3.bf16.msra.mxu1 %v332_v9  ;;  %v22_v32 = vld [vmem:[%s500_s0 + $0x28] sm:$0xff]  ;;  %v19_v50 = vld [vmem:[%s500_s0 + $0x10] sm:$0xff]  ;;  %v24_v55 = vld [vmem:[%s500_s0 + $0x38] sm:$0xff] }
   0xa   :  { %111 = vperm.xlu1 %346, %v85_v5   ;;  %91 = vperm.xlu0 %345, %v81_v6   ;;  %v20_v56 = vld [vmem:[%s500_s0 + $0x18] sm:$0xff] }
   0xb   :  { %337 = vmatprep.subr.bf16.mxu0 %v336_v14  ;;  %341 = vmatprep.subr.bf16.mxu1 %v336_v14 }
   0xd   :  { %339 = vmatpush3.bf16.msra.mxu0 %v336_v14  ;;  %343 = vmatpush3.bf16.msra.mxu1 %v336_v14 }
   0xe   :  { %116 = vperm.xlu1 %346, %v86_v10   ;;  %96 = vperm.xlu0 %345, %v82_v11  }
  0x12   :  { %65 = vperm.xlu1 %346, %v31_v15   ;;  %45 = vperm.xlu0 %345, %v27_v16  }
  0x16   :  { %70 = vperm.xlu1 %346, %v32_v17   ;;  %50 = vperm.xlu0 %345, %v28_v18  }
  0x1a   :  { %121 = vperm.xlu1 %346, %v87_v19   ;;  %101 = vperm.xlu0 %345, %v83_v20  }
  0x1e   :  { %126 = vperm.xlu1 %346, %v88_v21   ;;  %106 = vperm.xlu0 %345, %v84_v22  }
  0x81   :  { %v41_v23 = vpop.permute.xlu1 %40  ;;  %v36_v24 = vpop.permute.xlu0 %35 }
  0x82   :  { %v73_v29 = vmul.f32 %v36_v24, %v17_v25  ;;  %v74_v37 = vmul.f32 %v41_v23, %v18_v31 }
  0x85   :  { %v61_v26 = vpop.permute.xlu1 %60  ;;  %v56_v27 = vpop.permute.xlu0 %55 }
  0x86   :  { %v77_v30 = vmul.f32 %v56_v27, %v21_v28  ;;  %v78_v38 = vmul.f32 %v61_v26, %v22_v32 }
  0x89   :  { %v112_v33 = vpop.permute.xlu1 %111  ;;  %v92_v34 = vpop.permute.xlu0 %91 }
  0x8a   :  { %v133_v35 = vadd.f32 %v112_v33, %v77_v30  ;;  %v129_v36 = vadd.f32 %v92_v34, %v73_v29 }
  0x8c   :  { %v141_v39 = vmax.f32 %v133_v35, 0.0  ;;  %v137_v40 = vmax.f32 %v129_v36, 0.0 }
  0x8d   :  { %v117_v41 = vpop.permute.xlu1 %116  ;;  %v97_v42 = vpop.permute.xlu0 %96 }
  0x8e   :  { %v134_v43 = vadd.f32 %v117_v41, %v78_v38  ;;  %v130_v44 = vadd.f32 %v97_v42, %v74_v37  ;;  %320 = vmatprep.mubr.msk.f32.mxu0 %vm149_vm0, %v137_v40  ;;  %326 = vmatprep.mubr.msk.f32.mxu1 %vm149_vm0, %v141_v39 }
  0x90   :  { %v142_v45 = vmax.f32 %v134_v43, 0.0  ;;  %v138_v46 = vmax.f32 %v130_v44, 0.0 }
  0x91   :  { %v66_v47 = vpop.permute.xlu1 %65  ;;  %v46_v48 = vpop.permute.xlu0 %45 }
  0x92   :  { %321 = vmatmul.mubr.msk.f32.vlgmr.msra.gmra.mrb[0].mxu0 %vm149_vm0, %v138_v46  ;;  %327 = vmatmul.mubr.msk.f32.vlgmr.msra.gmra.mrb[0].mxu1 %vm149_vm0, %v142_v45  ;;  %v79_v53 = vmul.f32 %v66_v47, %v23_v49  ;;  %v75_v54 = vmul.f32 %v46_v48, %v19_v50 }
  0x95   :  { %v71_v51 = vpop.permute.xlu1 %70  ;;  %v51_v52 = vpop.permute.xlu0 %50 }
  0x96   :  { %v80_v61 = vmul.f32 %v71_v51, %v24_v55  ;;  %v76_v62 = vmul.f32 %v51_v52, %v20_v56 }
  0x99   :  { %v122_v57 = vpop.permute.xlu1 %121  ;;  %v102_v58 = vpop.permute.xlu0 %101 }
  0x9a   :  { %v135_v59 = vadd.f32 %v122_v57, %v79_v53  ;;  %v131_v60 = vadd.f32 %v102_v58, %v75_v54 }
  0x9c   :  { %v143_v63 = vmax.f32 %v135_v59, 0.0  ;;  %v139_v0 = vmax.f32 %v131_v60, 0.0 }
  0x9d   :  { %v127_v1 = vpop.permute.xlu1 %126  ;;  %v107_v2 = vpop.permute.xlu0 %106 }
  0x9e   :  { %v136_v3 = vadd.f32 %v127_v1, %v80_v61  ;;  %v132_v4 = vadd.f32 %v107_v2, %v76_v62  ;;  %323 = vmatprep.mubr.msk.f32.mxu0 %vm149_vm0, %v139_v0  ;;  %329 = vmatprep.mubr.msk.f32.mxu1 %vm149_vm0, %v143_v63 }
  0xa0   :  { %v144_v5 = vmax.f32 %v136_v3, 0.0  ;;  %v140_v6 = vmax.f32 %v132_v4, 0.0 }
  0xa2   :  { %324 = vmatmul.mubr.msk.f32.gmra.mrb[2].mxu0 %vm149_vm0, %v140_v6  ;;  %330 = vmatmul.mubr.msk.f32.gmra.mrb[2].mxu1 %vm149_vm0, %v144_v5 }
 0x165   :  { %v322_v7 = vpop.f32.mrb[0].mxu0  ;;  %v328_v8 = vpop.f32.mrb[0].mxu1 }
 0x166   :  { %281 = vst.msk [vmem:[%s501_s4 + $0x8] sm:$0xff] %vm279_vm1, %v322_v7  ;;  %285 = vst.msk [vmem:[%s501_s4 + $0x28] sm:$0xff] %vm279_vm1, %v328_v8  ;;  %v240_v9 = vpop.f32.mrb[1].mxu0  ;;  %v260_v10 = vpop.f32.mrb[1].mxu1 }
 0x167   :  { %280 = vst.msk [vmem:[%s501_s4] sm:$0xff] %vm279_vm1, %v240_v9  ;;  %284 = vst.msk [vmem:[%s501_s4 + $0x20] sm:$0xff] %vm279_vm1, %v260_v10 }
 0x175   :  { %v325_v11 = vpop.f32.mrb[2].mxu0  ;;  %v331_v12 = vpop.f32.mrb[2].mxu1 }
 0x176   :  { %283 = vst.msk [vmem:[%s501_s4 + $0x18] sm:$0xff] %vm279_vm1, %v325_v11  ;;  %287 = vst.msk [vmem:[%s501_s4 + $0x38] sm:$0xff] %vm279_vm1, %v331_v12  ;;  %v250_v13 = vpop.f32.mrb[3].mxu0  ;;  %v270_v14 = vpop.f32.mrb[3].mxu1 }
 0x177   :  { %282 = vst.msk [vmem:[%s501_s4 + $0x10] sm:$0xff] %vm279_vm1, %v250_v13  ;;  %286 = vst.msk [vmem:[%s501_s4 + $0x30] sm:$0xff] %vm279_vm1, %v270_v14 }

</bundles_post_ra>
